<compile_context>
chip_gen: v5e
topology: v5e:2x2
jax: 0.10.0
libtpu: 0.0.40
codegen_flags: <defaults>
</compile_context>

<pallas_src>
import functools

import jax
import jax.numpy as jnp
from jax.experimental import pallas as pl
from jax.experimental.pallas import tpu as pltpu

BN_EPS = 1e-5
LANE = 128


def _round_up(v, m):
    return (v + m - 1) // m * m


def _pad_to(arr, shape):
    return jnp.pad(arr, [(0, s - d) for d, s in zip(arr.shape, shape)])


def _vmem_capacity_bytes():
    """Generation-aware VMEM capacity (falls back to the v7x per-TC 64 MiB)."""
    try:
        cap = getattr(pltpu.get_tpu_info(), "vmem_capacity_bytes", None)
        if cap:
            return int(cap)
    except Exception:
        pass
    return 64 * 1024 * 1024


def gnn_kernel(a_ref, x_ref, w_ref, b_ref, g_ref, be_ref, pool_ref,
               out_ref, h_ref, acc_ref, *, n_real):
    """Grid = (3 layers, K column-slabs of A_hat).

    a_ref   : (N_pad, TK)       bf16  A_hat (resident: TK == N_pad, DMA'd once;
                                            streaming: column slab per k step)
    x_ref   : (N_pad, F_pad)    bf16  padded node features (resident)
    w_ref   : (1, F_pad, F_pad) bf16  this layer's padded weight
    b_ref   : (1, 1, F_pad)     f32   this layer's conv bias
    g_ref   : (1, 1, F_pad)     f32   this layer's BN gamma
    be_ref  : (1, 1, F_pad)     f32   this layer's BN beta
    pool_ref: (G_pad, N_pad)    bf16  exact 0/1 graph-membership matrix
    out_ref : (G_pad, F_pad)    f32   un-scaled pooled sums (scaled in wrapper)
    h_ref   : (N_pad, F_pad)    bf16  VMEM scratch -- current layer's input H
    acc_ref : (N_pad, F_pad)    f32   VMEM scratch -- propagation accumulator
    """
    l = pl.program_id(0)
    k = pl.program_id(1)
    num_l = pl.num_programs(0)
    num_k = pl.num_programs(1)
    tk = a_ref.shape[1]

    # Load the layer-0 input into the resident H scratch once.
    @pl.when(jnp.logical_and(l == 0, k == 0))
    def _():
        h_ref[...] = x_ref[...]

    # acc (+)= A_hat[:, k-slab] @ H[k-slab, :]   (bf16 operands, f32 accumulate)
    start = pl.multiple_of(k * tk, tk)
    h_k = h_ref[pl.ds(start, tk), :]
    prod = jnp.dot(a_ref[...], h_k, preferred_element_type=jnp.float32)

    @pl.when(k == 0)
    def _():
        acc_ref[...] = prod          # direct write: no zero-init + add pass

    @pl.when(k > 0)
    def _():
        acc_ref[...] += prod

    # Layer epilogue: linear + bias, BatchNorm over *real* nodes, ReLU.
    @pl.when(k == num_k - 1)
    def _():
        h = jnp.dot(acc_ref[...].astype(jnp.bfloat16), w_ref[0],
                    preferred_element_type=jnp.float32)
        h = h + b_ref[0]
        # Mask padded node rows out of the BatchNorm statistics.
        row = jax.lax.broadcasted_iota(jnp.int32, (h.shape[0], 1), 0)
        valid = (row < n_real).astype(jnp.float32)
        inv_n = 1.0 / float(n_real)
        mean = jnp.sum(h * valid, axis=0, keepdims=True) * inv_n
        centered = (h - mean) * valid
        var = jnp.sum(centered * centered, axis=0, keepdims=True) * inv_n
        h = (h - mean) * jax.lax.rsqrt(var + BN_EPS) * g_ref[0] + be_ref[0]
        h = jnp.maximum(h, 0.0)                      # ReLU
        h_ref[...] = h.astype(jnp.bfloat16)          # next layer's input

    # After the last layer: pooled per-graph SUMS as a small bf16 MXU matmul
    # (0/1 membership matrix is exact in bf16; 1/count applied in the wrapper).
    @pl.when(jnp.logical_and(l == num_l - 1, k == num_k - 1))
    def _():
        out_ref[...] = jnp.dot(pool_ref[...], h_ref[...],
                               preferred_element_type=jnp.float32)


def simple_gnn_forward(x, edge_index, batch, params, num_graphs):
    """x: [N, F_in] f32, edge_index: [2, E] int32, batch: [N] int32 -> [G, out]."""
    n, f_in = x.shape
    hidden = params["w1"].shape[1]
    out_dim = params["w3"].shape[1]

    # ---- padded / lane-dense sizes (N padding decoupled from slab width) ----
    f_pad = _round_up(max(f_in, hidden, out_dim), LANE)
    n_pad = _round_up(n, LANE)
    g_pad = _round_up(num_graphs, 8)

    # ---- generation-aware VMEM budget -> resident vs streamed A_hat ----
    vmem_cap = _vmem_capacity_bytes()
    vmem_budget = int(vmem_cap * 0.85)
    # Conservative working set (x2 on BlockSpec blocks for double buffering).
    base = (2 * n_pad * f_pad * 2        # X bf16
            + 2 * f_pad * f_pad * 2      # W_l bf16
            + 2 * g_pad * n_pad * 2      # pool bf16
            + 2 * g_pad * f_pad * 4      # out f32
            + n_pad * f_pad * 2          # H scratch bf16
            + n_pad * f_pad * 4          # acc scratch f32
            + 6 * 2 * f_pad * 4)         # bias / gamma / beta blocks
    a_resident_bytes = 2 * n_pad * n_pad * 2
    resident = (base + a_resident_bytes) <= vmem_budget

    if resident:
        # A_hat DMA'd ONCE for the whole 3-layer grid (constant index map).
        tk = n_pad
        num_k = 1
        a_spec = pl.BlockSpec((n_pad, n_pad), lambda l, k: (0, 0))
    else:
        # Streaming fallback: TK is a divisor of N_pad chosen from the budget;
        # 3-deep buffering hides the per-layer epilogue behind the next DMAs.
        tk = 128
        for cand in (2048, 1024, 512, 256, 128):
            if n_pad % cand == 0 and base + 3 * n_pad * cand * 2 <= vmem_budget:
                tk = cand
                break
        num_k = n_pad // tk
        a_spec = pl.BlockSpec((n_pad, tk), lambda l, k: (0, k),
                              pipeline_mode=pl.Buffered(3))

    # ---- glue: dense normalized adjacency  D^-1/2 (A + I)^T D^-1/2 ----
    # Duplicate edges accumulate (PyG GCNConv scatter-add semantics); degrees
    # are target (in-) degrees after adding unit self-loops.
    adj = jnp.zeros((n, n), jnp.float32).at[edge_index[0], edge_index[1]].add(1.0)
    adj = adj + jnp.eye(n, dtype=jnp.float32)
    deg = jnp.sum(adj, axis=0)
    d_inv_sqrt = jnp.where(deg > 0, jax.lax.rsqrt(deg), 0.0)
    a_hat = d_inv_sqrt[:, None] * adj.T * d_inv_sqrt[None, :]
    a_hat = _pad_to(a_hat, (n_pad, n_pad)).astype(jnp.bfloat16)

    # ---- glue: exact 0/1 pool matrix (bf16) + f32 per-graph counts ----
    one_hot = (batch[None, :] == jnp.arange(num_graphs, dtype=batch.dtype)[:, None])
    one_hot = one_hot.astype(jnp.float32)
    counts = jnp.maximum(jnp.sum(one_hot, axis=1, keepdims=True), 1.0)   # (G, 1)
    pool = _pad_to(one_hot, (g_pad, n_pad)).astype(jnp.bfloat16)

    x_p = _pad_to(x, (n_pad, f_pad)).astype(jnp.bfloat16)

    # ---- stacked, padded per-layer parameters (selected by the layer axis) ----
    w_stack = jnp.stack([_pad_to(params["w1"], (f_pad, f_pad)),
                         _pad_to(params["w2"], (f_pad, f_pad)),
                         _pad_to(params["w3"], (f_pad, f_pad))]).astype(jnp.bfloat16)
    b_stack = jnp.stack([_pad_to(params["b1"], (1, f_pad)),
                         _pad_to(params["b2"], (1, f_pad)),
                         _pad_to(params["b3"], (1, f_pad))])
    g_stack = jnp.stack([_pad_to(params["g1"], (1, f_pad)),
                         _pad_to(params["g2"], (1, f_pad)),
                         _pad_to(params["g3"], (1, f_pad))])
    be_stack = jnp.stack([_pad_to(params["be1"], (1, f_pad)),
                          _pad_to(params["be2"], (1, f_pad)),
                          _pad_to(params["be3"], (1, f_pad))])

    kernel = functools.partial(gnn_kernel, n_real=n)

    out = pl.pallas_call(
        kernel,
        out_shape=jax.ShapeDtypeStruct((g_pad, f_pad), jnp.float32),
        grid_spec=pltpu.PrefetchScalarGridSpec(
            num_scalar_prefetch=0,
            grid=(3, num_k),
            in_specs=[
                a_spec,                                                   # A_hat
                pl.BlockSpec((n_pad, f_pad), lambda l, k: (0, 0)),        # X (resident)
                pl.BlockSpec((1, f_pad, f_pad), lambda l, k: (l, 0, 0)),  # W_l
                pl.BlockSpec((1, 1, f_pad), lambda l, k: (l, 0, 0)),      # b_l
                pl.BlockSpec((1, 1, f_pad), lambda l, k: (l, 0, 0)),      # gamma_l
                pl.BlockSpec((1, 1, f_pad), lambda l, k: (l, 0, 0)),      # beta_l
                pl.BlockSpec((g_pad, n_pad), lambda l, k: (0, 0)),        # pool 0/1
            ],
            out_specs=pl.BlockSpec((g_pad, f_pad), lambda l, k: (0, 0)),
            scratch_shapes=[
                pltpu.VMEM((n_pad, f_pad), jnp.bfloat16),   # resident H
                pltpu.VMEM((n_pad, f_pad), jnp.float32),    # propagate accumulator
            ],
        ),
        compiler_params=pltpu.CompilerParams(
            # Both axes carry data dependences (layer chain via the H scratch,
            # k is the propagation reduction) -> sequential.
            dimension_semantics=("arbitrary", "arbitrary"),
            vmem_limit_bytes=vmem_budget,
        ),
    )(a_hat, x_p, w_stack, b_stack, g_stack, be_stack, pool)

    # mean pool = pooled sums / per-graph node counts (tiny f32 op on [G, out]).
    return out[:num_graphs, :out_dim] / counts


def init_params(key, input_dim, hidden_dim, output_dim):
    """Glorot weights, zero conv bias, BN gamma=1 / beta=0 (PyTorch defaults)."""
    k1, k2, k3 = jax.random.split(key, 3)

    def glorot(k, fan_in, fan_out):
        limit = (6.0 / (fan_in + fan_out)) ** 0.5
        return jax.random.uniform(k, (fan_in, fan_out), jnp.float32, -limit, limit)

    return {
        "w1": glorot(k1, input_dim, hidden_dim),
        "b1": jnp.zeros((1, hidden_dim), jnp.float32),
        "g1": jnp.ones((1, hidden_dim), jnp.float32),
        "be1": jnp.zeros((1, hidden_dim), jnp.float32),
        "w2": glorot(k2, hidden_dim, hidden_dim),
        "b2": jnp.zeros((1, hidden_dim), jnp.float32),
        "g2": jnp.ones((1, hidden_dim), jnp.float32),
        "be2": jnp.zeros((1, hidden_dim), jnp.float32),
        "w3": glorot(k3, hidden_dim, output_dim),
        "b3": jnp.zeros((1, output_dim), jnp.float32),
        "g3": jnp.ones((1, output_dim), jnp.float32),
        "be3": jnp.zeros((1, output_dim), jnp.float32),
    }


if __name__ == "__main__":
    INPUT_DIM, HIDDEN_DIM, OUTPUT_DIM = 8, 32, 16
    N_NODES, N_EDGES, N_GRAPHS = 16, 40, 2

    key = jax.random.PRNGKey(0)
    kx, ke, kp = jax.random.split(key, 3)

    x = jax.random.normal(kx, (N_NODES, INPUT_DIM), jnp.float32)
    # random undirected edge list (both directions), like typical PyG data
    src = jax.random.randint(ke, (N_EDGES,), 0, N_NODES, jnp.int32)
    dst = jax.random.randint(jax.random.fold_in(ke, 1), (N_EDGES,), 0, N_NODES,
                             jnp.int32)
    edge_index = jnp.stack(
        [jnp.concatenate([src, dst]), jnp.concatenate([dst, src])], axis=0
    ).astype(jnp.int32)
    # nodes 0..7 -> graph 0, nodes 8..15 -> graph 1
    batch = (jnp.arange(N_NODES, dtype=jnp.int32) // (N_NODES // N_GRAPHS))

    params = init_params(kp, INPUT_DIM, HIDDEN_DIM, OUTPUT_DIM)

    out = simple_gnn_forward(x, edge_index, batch, params, N_GRAPHS)
    jax.block_until_ready(out)
    assert out.shape == (N_GRAPHS, OUTPUT_DIM)
    assert bool(jnp.all(jnp.isfinite(out)))
    print("KERNEL_OK")
</pallas_src>

<mosaic_0001>
module attributes {stable_mosaic.version = 11 : i64} {
  func.func @gnn_kernel(%arg0: i32, %arg1: i32, %arg2: memref<128x128xbf16, #tpu.memory_space<vmem>>, %arg3: memref<128x128xbf16, #tpu.memory_space<vmem>>, %arg4: memref<1x128x128xbf16, #tpu.memory_space<vmem>>, %arg5: memref<1x1x128xf32, #tpu.memory_space<vmem>>, %arg6: memref<1x1x128xf32, #tpu.memory_space<vmem>>, %arg7: memref<1x1x128xf32, #tpu.memory_space<vmem>>, %arg8: memref<8x128xbf16, #tpu.memory_space<vmem>>, %arg9: memref<8x128xf32, #tpu.memory_space<vmem>>, %arg10: memref<128x128xbf16, #tpu.memory_space<vmem>>, %arg11: memref<128x128xf32, #tpu.memory_space<vmem>>) attributes {dimension_semantics = [#tpu.dimension_semantics<arbitrary>, #tpu.dimension_semantics<arbitrary>], iteration_bounds = array<i64: 3, 1>, scalar_prefetch = 0 : i64, scratch_operands = 2 : i64, tpu.core_type = #tpu.core_type<tc>, window_params = [{pipeline_mode = #tpu.pipeline_mode<synchronous>, transform_indices = @transform_0, window_bounds = array<i64: 128, 128>}, {pipeline_mode = #tpu.pipeline_mode<synchronous>, transform_indices = @transform_1, window_bounds = array<i64: 128, 128>}, {transform_indices = @transform_2, window_bounds = array<i64: 1, 128, 128>}, {transform_indices = @transform_3, window_bounds = array<i64: 1, 1, 128>}, {transform_indices = @transform_4, window_bounds = array<i64: 1, 1, 128>}, {transform_indices = @transform_5, window_bounds = array<i64: 1, 1, 128>}, {pipeline_mode = #tpu.pipeline_mode<synchronous>, transform_indices = @transform_6, window_bounds = array<i64: 8, 128>}, {pipeline_mode = #tpu.pipeline_mode<synchronous>, transform_indices = @transform_7, window_bounds = array<i64: 8, 128>}]} {
    %c0_i32 = arith.constant 0 : i32
    %0 = arith.cmpi eq, %arg0, %c0_i32 : i32
    %c0_i32_0 = arith.constant 0 : i32
    %1 = arith.cmpi eq, %arg1, %c0_i32_0 : i32
    %2 = arith.andi %0, %1 : i1
    %3 = arith.extui %2 : i1 to i32
    %c0_i32_1 = arith.constant 0 : i32
    %4 = arith.cmpi ne, %3, %c0_i32_1 : i32
    scf.if %4 {
      %c0_12 = arith.constant 0 : index
      %c0_13 = arith.constant 0 : index
      %25 = vector.load %arg3[%c0_12, %c0_13] : memref<128x128xbf16, #tpu.memory_space<vmem>>, vector<128x128xbf16>
      %c0_14 = arith.constant 0 : index
      %c0_15 = arith.constant 0 : index
      %26 = vector.load %arg10[%c0_14, %c0_15] : memref<128x128xbf16, #tpu.memory_space<vmem>>, vector<128x128xbf16>
      tpu.vector_store %arg10[%c0_14, %c0_15], %25 {strides = array<i32>} : memref<128x128xbf16, #tpu.memory_space<vmem>>, vector<128x128xbf16>,
    } else {
    }
    %c128_i32 = arith.constant 128 : i32
    %5 = arith.muli %arg1, %c128_i32 : i32
    %6 = tpu.assume_multiple %5, 128 : i32
    %7 = arith.index_cast %6 : i32 to index
    %c0 = arith.constant 0 : index
    %8 = vector.load %arg10[%7, %c0] : memref<128x128xbf16, #tpu.memory_space<vmem>>, vector<128x128xbf16>
    %c0_2 = arith.constant 0 : index
    %c0_3 = arith.constant 0 : index
    %9 = vector.load %arg2[%c0_2, %c0_3] : memref<128x128xbf16, #tpu.memory_space<vmem>>, vector<128x128xbf16>
    %cst = arith.constant dense<0.000000e+00> : vector<128x128xf32>
    %10 = tpu.matmul %9, %8, %cst {dimension_numbers = #tpu.dot_dimension_numbers<[1], [0], [0], [1], [0, 0, 1, 1], [], []>} : vector<128x128xbf16>, vector<128x128xbf16>, vector<128x128xf32> -> vector<128x128xf32>
    %c0_i32_4 = arith.constant 0 : i32
    %11 = arith.cmpi eq, %arg1, %c0_i32_4 : i32
    %12 = arith.extui %11 : i1 to i32
    %c0_i32_5 = arith.constant 0 : i32
    %13 = arith.cmpi ne, %12, %c0_i32_5 : i32
    scf.if %13 {
      %c0_12 = arith.constant 0 : index
      %c0_13 = arith.constant 0 : index
      %25 = vector.load %arg11[%c0_12, %c0_13] : memref<128x128xf32, #tpu.memory_space<vmem>>, vector<128x128xf32>
      tpu.vector_store %arg11[%c0_12, %c0_13], %10 {strides = array<i32>} : memref<128x128xf32, #tpu.memory_space<vmem>>, vector<128x128xf32>,
    } else {
    }
    %c0_i32_6 = arith.constant 0 : i32
    %14 = arith.cmpi sgt, %arg1, %c0_i32_6 : i32
    %15 = arith.extui %14 : i1 to i32
    %c0_i32_7 = arith.constant 0 : i32
    %16 = arith.cmpi ne, %15, %c0_i32_7 : i32
    scf.if %16 {
      %c0_12 = arith.constant 0 : index
      %c0_13 = arith.constant 0 : index
      %25 = vector.load %arg11[%c0_12, %c0_13] : memref<128x128xf32, #tpu.memory_space<vmem>>, vector<128x128xf32>
      %26 = arith.addf %25, %10 : vector<128x128xf32>
      %c0_14 = arith.constant 0 : index
      %c0_15 = arith.constant 0 : index
      %27 = vector.load %arg11[%c0_14, %c0_15] : memref<128x128xf32, #tpu.memory_space<vmem>>, vector<128x128xf32>
      tpu.vector_store %arg11[%c0_14, %c0_15], %26 {strides = array<i32>} : memref<128x128xf32, #tpu.memory_space<vmem>>, vector<128x128xf32>,
    } else {
    }
    %c0_i32_8 = arith.constant 0 : i32
    %17 = arith.cmpi eq, %arg1, %c0_i32_8 : i32
    %18 = arith.extui %17 : i1 to i32
    %c0_i32_9 = arith.constant 0 : i32
    %19 = arith.cmpi ne, %18, %c0_i32_9 : i32
    scf.if %19 {
      %c0_12 = arith.constant 0 : index
      %c0_13 = arith.constant 0 : index
      %25 = vector.load %arg11[%c0_12, %c0_13] : memref<128x128xf32, #tpu.memory_space<vmem>>, vector<128x128xf32>
      %26 = arith.truncf %25 : vector<128x128xf32> to vector<128x128xbf16>
      %c0_14 = arith.constant 0 : index
      %c0_15 = arith.constant 0 : index
      %c0_16 = arith.constant 0 : index
      %27 = vector.load %arg4[%c0_14, %c0_15, %c0_16] : memref<1x128x128xbf16, #tpu.memory_space<vmem>>, vector<1x128x128xbf16>
      %28 = vector.shape_cast %27 : vector<1x128x128xbf16> to vector<128x128xbf16>
      %cst_17 = arith.constant dense<0.000000e+00> : vector<128x128xf32>
      %29 = tpu.matmul %26, %28, %cst_17 {dimension_numbers = #tpu.dot_dimension_numbers<[1], [0], [0], [1], [0, 0, 1, 1], [], []>} : vector<128x128xbf16>, vector<128x128xbf16>, vector<128x128xf32> -> vector<128x128xf32>
      %c0_18 = arith.constant 0 : index
      %c0_19 = arith.constant 0 : index
      %c0_20 = arith.constant 0 : index
      %30 = vector.load %arg5[%c0_18, %c0_19, %c0_20] : memref<1x1x128xf32, #tpu.memory_space<vmem>>, vector<1x1x128xf32>
      %31 = vector.shape_cast %30 : vector<1x1x128xf32> to vector<1x128xf32>
      %32 = vector.broadcast %31 : vector<1x128xf32> to vector<128x128xf32>
      %33 = arith.addf %29, %32 : vector<128x128xf32>
      %34 = tpu.iota {dimensions = array<i32: 0>} : vector<128x1xi32>
      %c16_i32 = arith.constant 16 : i32
      %35 = vector.broadcast %c16_i32 : i32 to vector<128x1xi32>
      %36 = arith.cmpi slt, %34, %35 : vector<128x1xi32>
      %37 = arith.extui %36 : vector<128x1xi1> to vector<128x1xi32>
      %38 = arith.sitofp %37 : vector<128x1xi32> to vector<128x1xf32>
      %39 = vector.broadcast %38 : vector<128x1xf32> to vector<128x128xf32>
      %40 = arith.mulf %33, %39 : vector<128x128xf32>
      %cst_21 = arith.constant dense<0.000000e+00> : vector<128xf32>
      %41 = vector.multi_reduction <add>, %40, %cst_21 [0] : vector<128x128xf32> to vector<128xf32>
      %42 = vector.shape_cast %41 : vector<128xf32> to vector<1x128xf32>
      %cst_22 = arith.constant 6.250000e-02 : f32
      %43 = vector.broadcast %cst_22 : f32 to vector<1x128xf32>
      %44 = arith.mulf %42, %43 : vector<1x128xf32>
      %45 = vector.broadcast %44 : vector<1x128xf32> to vector<128x128xf32>
      %46 = arith.subf %33, %45 : vector<128x128xf32>
      %47 = vector.broadcast %38 : vector<128x1xf32> to vector<128x128xf32>
      %48 = arith.mulf %46, %47 : vector<128x128xf32>
      %49 = arith.mulf %48, %48 : vector<128x128xf32>
      %cst_23 = arith.constant dense<0.000000e+00> : vector<128xf32>
      %50 = vector.multi_reduction <add>, %49, %cst_23 [0] : vector<128x128xf32> to vector<128xf32>
      %51 = vector.shape_cast %50 : vector<128xf32> to vector<1x128xf32>
      %cst_24 = arith.constant 6.250000e-02 : f32
      %52 = vector.broadcast %cst_24 : f32 to vector<1x128xf32>
      %53 = arith.mulf %51, %52 : vector<1x128xf32>
      %54 = vector.broadcast %44 : vector<1x128xf32> to vector<128x128xf32>
      %55 = arith.subf %33, %54 : vector<128x128xf32>
      %cst_25 = arith.constant 9.99999974E-6 : f32
      %56 = vector.broadcast %cst_25 : f32 to vector<1x128xf32>
      %57 = arith.addf %53, %56 : vector<1x128xf32>
      %58 = math.rsqrt %57 : vector<1x128xf32>
      %59 = vector.broadcast %58 : vector<1x128xf32> to vector<128x128xf32>
      %60 = arith.mulf %55, %59 : vector<128x128xf32>
      %c0_26 = arith.constant 0 : index
      %c0_27 = arith.constant 0 : index
      %c0_28 = arith.constant 0 : index
      %61 = vector.load %arg6[%c0_26, %c0_27, %c0_28] : memref<1x1x128xf32, #tpu.memory_space<vmem>>, vector<1x1x128xf32>
      %62 = vector.shape_cast %61 : vector<1x1x128xf32> to vector<1x128xf32>
      %63 = vector.broadcast %62 : vector<1x128xf32> to vector<128x128xf32>
      %64 = arith.mulf %60, %63 : vector<128x128xf32>
      %c0_29 = arith.constant 0 : index
      %c0_30 = arith.constant 0 : index
      %c0_31 = arith.constant 0 : index
      %65 = vector.load %arg7[%c0_29, %c0_30, %c0_31] : memref<1x1x128xf32, #tpu.memory_space<vmem>>, vector<1x1x128xf32>
      %66 = vector.shape_cast %65 : vector<1x1x128xf32> to vector<1x128xf32>
      %67 = vector.broadcast %66 : vector<1x128xf32> to vector<128x128xf32>
      %68 = arith.addf %64, %67 : vector<128x128xf32>
      %cst_32 = arith.constant 0.000000e+00 : f32
      %69 = vector.broadcast %cst_32 : f32 to vector<128x128xf32>
      %70 = arith.maximumf %68, %69 : vector<128x128xf32>
      %71 = arith.truncf %70 : vector<128x128xf32> to vector<128x128xbf16>
      %c0_33 = arith.constant 0 : index
      %c0_34 = arith.constant 0 : index
      %72 = vector.load %arg10[%c0_33, %c0_34] : memref<128x128xbf16, #tpu.memory_space<vmem>>, vector<128x128xbf16>
      tpu.vector_store %arg10[%c0_33, %c0_34], %71 {strides = array<i32>} : memref<128x128xbf16, #tpu.memory_space<vmem>>, vector<128x128xbf16>,
    } else {
    }
    %c2_i32 = arith.constant 2 : i32
    %20 = arith.cmpi eq, %arg0, %c2_i32 : i32
    %c0_i32_10 = arith.constant 0 : i32
    %21 = arith.cmpi eq, %arg1, %c0_i32_10 : i32
    %22 = arith.andi %20, %21 : i1
    %23 = arith.extui %22 : i1 to i32
    %c0_i32_11 = arith.constant 0 : i32
    %24 = arith.cmpi ne, %23, %c0_i32_11 : i32
    scf.if %24 {
      %c0_12 = arith.constant 0 : index
      %c0_13 = arith.constant 0 : index
      %25 = vector.load %arg8[%c0_12, %c0_13] : memref<8x128xbf16, #tpu.memory_space<vmem>>, vector<8x128xbf16>
      %c0_14 = arith.constant 0 : index
      %c0_15 = arith.constant 0 : index
      %26 = vector.load %arg10[%c0_14, %c0_15] : memref<128x128xbf16, #tpu.memory_space<vmem>>, vector<128x128xbf16>
      %cst_16 = arith.constant dense<0.000000e+00> : vector<8x128xf32>
      %27 = tpu.matmul %25, %26, %cst_16 {dimension_numbers = #tpu.dot_dimension_numbers<[1], [0], [0], [1], [0, 0, 1, 1], [], []>} : vector<8x128xbf16>, vector<128x128xbf16>, vector<8x128xf32> -> vector<8x128xf32>
      %c0_17 = arith.constant 0 : index
      %c0_18 = arith.constant 0 : index
      %28 = vector.load %arg9[%c0_17, %c0_18] : memref<8x128xf32, #tpu.memory_space<vmem>>, vector<8x128xf32>
      tpu.vector_store %arg9[%c0_17, %c0_18], %27 {strides = array<i32>} : memref<8x128xf32, #tpu.memory_space<vmem>>, vector<8x128xf32>,
    } else {
    }
    return
  }
  func.func @transform_0(%arg0: i32, %arg1: i32) -> (i32, i32) {
    %c0_i32 = arith.constant 0 : i32
    %c0_i32_0 = arith.constant 0 : i32
    %c0_i32_1 = arith.constant 0 : i32
    return %c0_i32, %c0_i32_0 : i32, i32
  }
  func.func @transform_1(%arg0: i32, %arg1: i32) -> (i32, i32) {
    %c0_i32 = arith.constant 0 : i32
    %c0_i32_0 = arith.constant 0 : i32
    %c0_i32_1 = arith.constant 0 : i32
    return %c0_i32, %c0_i32_0 : i32, i32
  }
  func.func @transform_2(%arg0: i32, %arg1: i32) -> (i32, i32, i32) {
    %c0_i32 = arith.constant 0 : i32
    %c0_i32_0 = arith.constant 0 : i32
    %c0_i32_1 = arith.constant 0 : i32
    return %arg0, %c0_i32, %c0_i32_0 : i32, i32, i32
  }
  func.func @transform_3(%arg0: i32, %arg1: i32) -> (i32, i32, i32) {
    %c0_i32 = arith.constant 0 : i32
    %c0_i32_0 = arith.constant 0 : i32
    %c0_i32_1 = arith.constant 0 : i32
    return %arg0, %c0_i32, %c0_i32_0 : i32, i32, i32
  }
  func.func @transform_4(%arg0: i32, %arg1: i32) -> (i32, i32, i32) {
    %c0_i32 = arith.constant 0 : i32
    %c0_i32_0 = arith.constant 0 : i32
    %c0_i32_1 = arith.constant 0 : i32
    return %arg0, %c0_i32, %c0_i32_0 : i32, i32, i32
  }
  func.func @transform_5(%arg0: i32, %arg1: i32) -> (i32, i32, i32) {
    %c0_i32 = arith.constant 0 : i32
    %c0_i32_0 = arith.constant 0 : i32
    %c0_i32_1 = arith.constant 0 : i32
    return %arg0, %c0_i32, %c0_i32_0 : i32, i32, i32
  }
  func.func @transform_6(%arg0: i32, %arg1: i32) -> (i32, i32) {
    %c0_i32 = arith.constant 0 : i32
    %c0_i32_0 = arith.constant 0 : i32
    %c0_i32_1 = arith.constant 0 : i32
    return %c0_i32, %c0_i32_0 : i32, i32
  }
  func.func @transform_7(%arg0: i32, %arg1: i32) -> (i32, i32) {
    %c0_i32 = arith.constant 0 : i32
    %c0_i32_0 = arith.constant 0 : i32
    %c0_i32_1 = arith.constant 0 : i32
    return %c0_i32, %c0_i32_0 : i32, i32
  }
}

</mosaic_0001>

<bundles_post_ra>
// kernel: tpu_custom_call.1
= control target key start
LH: loop header
LB: loop body
LE: loop exit
PB: predicated region body
PF: predicated region fallthrough
CT: control target
= control target key end

     0   :  { %s2280_s0 = inlined_call_operand.hbm [shape: bf16[128,128], index: 0, kind: input, shape index: {}]   ;;  %s2281_s1 = inlined_call_operand.hbm [shape: bf16[128,128], index: 1, kind: input, shape index: {}]   ;;  %s2282_s2 = inlined_call_operand.hbm [shape: bf16[3,128,128], index: 2, kind: input, shape index: {}]   ;;  %s2283_s3 = inlined_call_operand.hbm [shape: f32[3,1,128], index: 3, kind: input, shape index: {}]   ;;  %s2284_s4 = inlined_call_operand.hbm [shape: f32[3,1,128], index: 4, kind: input, shape index: {}]   ;;  %s2285_s5 = inlined_call_operand.hbm [shape: f32[3,1,128], index: 5, kind: input, shape index: {}]   ;;  %s2286_s6 = inlined_call_operand.vmem [shape: bf16[8,128], index: 6, kind: input, shape index: {}]   ;;  %s2287_s7 = inlined_call_operand.hbm [shape: f32[8,128], index: 7, kind: output, shape index: {}]  }
   0x1   :  { %2293 = sst [smem:[#allocation19_spill]] %s2280_s0 }
   0x2   :  { %2294 = sst [smem:[#allocation20_spill]] %s2282_s2 }
   0x3   :  { %2295 = sst [smem:[#allocation21_spill]] %s2283_s3 }
   0x4   :  { %2296 = sst [smem:[#allocation22_spill]] %s2284_s4 }
   0x5   :  { %2297 = sst [smem:[#allocation23_spill]] %s2287_s7 }
   0x6   :  { %12 = vsyncpa [#allocation5], 0 }
   0x7   :  { %13 = vsyncpa [#allocation8], 0 }
   0x8   :  { %14 = vsyncpa [#allocation6], 0  ;;  %s2036_s24 = smov 0   ;;  %s2038_s25 = smov 0  }
   0x9   :  { %s2040_s26 = smov 0   ;;  %s2042_s27 = smov 0  }
   0xa   :  { %s2044_s28 = smov 0   ;;  %s2046_s29 = smov 0  }
   0xb LB: > { %s2065_s30 = sadd.s32 4294967295, %s1989_s29   ;;  %s81_s8 = sadd.s32 1, %s1977_s26  ;;  %s1989_s29 = sphi %s2046_s29, %s20_s29   ;;  %s1985_s28 = sphi %s2044_s28, %s2316_s28   ;;  %s1981_s27 = sphi %s2042_s27, %s2315_s27   ;;  %s1977_s26 = sphi %s2040_s26, %s2314_s26   ;;  %s1973_s25 = sphi %s2038_s25, %s2313_s25   ;;  %s1969_s24 = sphi %s2036_s24, %s2312_s24  }
   0xc   : > { %p88_p0 = scmp.ne.s32.totalorder %s1977_s26, %s1973_s25  ;;  %p89_p1 = scmp.eq.s32.totalorder %s1989_s29, 0 }
   0xd   : > { %p94_p2 = scmp.ne.s32.totalorder %s1973_s25, %s1969_s24  ;;  %p95_p3 = scmp.eq.s32.totalorder %s2065_s30, 0 }
   0xe   : > { %p2073_p4 = por %p89_p1, %p88_p0  ;;  %p1371_p5 = scmp.ge.s32.totalorder %s1989_s29, 1 }
   0xf   : > { %p2080_p6 = por %p95_p3, %p94_p2  ;;  %p225_p7 = scmp.lt.s32.totalorder %s1989_s29, 4 }
  0x10   : > { %s2300_s0 = sld [smem:[#allocation19_spill]]  ;;  %s1991_s15 = smov [#allocation4]  }
  0x11   : > { %p2088_p8 = pnand %p1371_p5, %p225_p7  ;;  %s238_s16 = sshll.u32 %s1991_s15, 4  ;;  %s239_s16 = int_to_ptr.vmem [resolvable:$true] %s238_s16 }
  0x12   : > { %p1656_p11 = scmp.lt.s32.totalorder %s1989_s29, 3  ;;  %s2288_s18 = smov 64  }
  0x13   : > { %p1634_p9 = pneg %p2088_p8  ;;  %s2290_s19 = smov 4  }
  0x14   : > { %s32_s20 = sadd.s32 1, %s1985_s28  ;;  %s269_s21 = sand.u32 1, %s1989_s29  }
  0x15   : > { %p2096_p10 = pnand %p1634_p9, %p95_p3  ;;  %p34_p12 = scmp.ge.s32.totalorder %s32_s20, 3 }
  0x16   : > { %s236_s13 = sshll.u32 %s2300_s0, 4  ;;  %s2109_s22 = sand.u32 1, %s1977_s26   ;;  %s237_s13 = int_to_ptr.hbm [resolvable:$true] %s236_s13 }
  0x17   : > { %1637 = dma.hbm_to_vmem [thread:$0]  (!%p2096_p10), %s237_s13, 1024, %s239_s16, [#allocation5], %s2288_s18, %s2288_s18, %s2290_s19  }
  0x18   : > { %s1516_s23 = sshll.u32 %s1985_s28, 6  ;;  %s2318_s20 = smov (%p34_p12, %s32_s20), 0 }
  0x19   : > { %2303 = sst [smem:[#allocation18_spill]] %s2318_s20  ;;  %s1375_s24 = sshll.u32 %s2109_s22, 6 }
  0x1a   : > { %s2304_s2 = sld [smem:[#allocation20_spill]]  ;;  %s78_s13 = ssub.s32 %s1985_s28, %s2318_s20 }
  0x1b   : > { %p79_p13 = scmp.eq.s32.totalorder %s78_s13, 0  ;;  %s273_s18 = scalar_lea.vmem [#allocation9], %s1375_s24 }
  0x1c   : > { %s281_s19 = sshll.u32 %s273_s18, 4  ;;  %p2129_p0 = pnand %p1656_p11, %p2073_p4  ;;  %s282_s19 = int_to_ptr.vmem [resolvable:$true] %s281_s19 }
  0x1d   : > { %s2123_s0 = scalar_select %p79_p13, %s1977_s26, %s81_s8  }
  0x1e   : > { %s2306_s3 = sld [smem:[#allocation21_spill]]  ;;  %s270_s24 = scalar_lea.sflag [#allocation5], %s269_s21 }
  0x1f   : > { %s2307_s18 = smov 4   ;;  %s2308_s8 = smov 64  }
  0x20   : > { %s278_s15 = scalar_lea.hbm %s2304_s2, %s1516_s23  ;;  %s294_s9 = scalar_lea.vmem [#allocation10], %s2109_s22 }
  0x21   : > { %s279_s16 = sshll.u32 %s278_s15, 4  ;;  %s301_s13 = sshll.u32 %s294_s9, 4  ;;  %s280_s16 = int_to_ptr.hbm [resolvable:$true] %s279_s16  ;;  %s302_s13 = int_to_ptr.vmem [resolvable:$true] %s301_s13 }
  0x22   : > { %1644 = dma.hbm_to_vmem [thread:$0]  (!%p2129_p0), %s280_s16, 1024, %s282_s19, %s270_s24, %s2308_s8, %s2308_s8, %s2307_s18  }
  0x23   : > { %s2309_s4 = sld [smem:[#allocation22_spill]]  ;;  %s250_s20 = sshll.u32 %s2281_s1, 4  ;;  %s251_s20 = int_to_ptr.hbm [resolvable:$true] %s250_s20 }
  0x24   : > { %s297_s12 = scalar_lea.hbm %s2306_s3, %s1985_s28  ;;  %s1994_s9 = smov [#allocation7]  }
  0x25   : > { %s299_s15 = sshll.u32 %s297_s12, 4  ;;  %s311_s12 = scalar_lea.vmem [#allocation11], %s2109_s22  ;;  %s300_s15 = int_to_ptr.hbm [resolvable:$true] %s299_s15 }
  0x26   : > { %1647 = dma.hbm_to_vmem [thread:$0]  (!%p2129_p0), %s300_s15, 16, %s302_s13, %s270_s24  }
  0x27   : > { %s318_s21 = sshll.u32 %s311_s12, 4  ;;  %s252_s15 = sshll.u32 %s1994_s9, 4  ;;  %s319_s21 = int_to_ptr.vmem [resolvable:$true] %s318_s21  ;;  %s253_s15 = int_to_ptr.vmem [resolvable:$true] %s252_s15 }
  0x28   : > { %s331_s23 = scalar_lea.hbm %s2285_s5, %s1985_s28  ;;  %s328_s12 = scalar_lea.vmem [#allocation12], %s2109_s22 }
  0x29   : > { %s314_s2 = scalar_lea.hbm %s2309_s4, %s1985_s28  ;;  %s335_s4 = sshll.u32 %s328_s12, 4  ;;  %s336_s4 = int_to_ptr.vmem [resolvable:$true] %s335_s4 }
  0x2a   : > { %s316_s3 = sshll.u32 %s314_s2, 4  ;;  %s333_s2 = sshll.u32 %s331_s23, 4  ;;  %s317_s3 = int_to_ptr.hbm [resolvable:$true] %s316_s3  ;;  %s334_s2 = int_to_ptr.hbm [resolvable:$true] %s333_s2 }
  0x2b   : > { %1650 = dma.hbm_to_vmem [thread:$0]  (!%p2129_p0), %s317_s3, 16, %s319_s21, %s270_s24  }
  0x2c   : > { %1640 = dma.hbm_to_vmem [thread:$0]  (!%p2096_p10), %s251_s20, 1024, %s253_s15, [#allocation8], %s2308_s8, %s2308_s8, %s2307_s18  }
  0x2d   : > { %1653 = dma.hbm_to_vmem [thread:$0]  (!%p2129_p0), %s334_s2, 16, %s336_s4, %s270_s24  }
  0x2e   : > { %344 = sbr.rel (%p2088_p8) target bundleno = 735 (0x2df), region = 48 }
  0x33   : > { %1952 = dma.done.wait (%p95_p3), [#allocation5], 1024  }
  0x34   : > { %1954 = vsyncadd (%p95_p3), [#allocation5], 4294966272 }
  0x35   : > { %1956 = dma.done.wait (%p95_p3), [#allocation8], 1024  }
  0x36   : > { %1958 = vsyncadd (%p95_p3), [#allocation8], 4294966272  ;;  %s356_s3 = sand.u32 1, %s2065_s30   ;;  %s2179_s4 = sand.u32 1, %s1973_s25  }
  0x37   : > { %s1381_s7 = sshll.u32 %s2179_s4, 6  ;;  %s357_s14 = scalar_lea.sflag [#allocation5], %s356_s3 }
  0x38   : > { %s2182_s17 = scalar_lea.vmem [#allocation9], %s1381_s7 }
  0x39   : > { %1960 = dma.done.wait (%p2080_p6), %s357_s14, 1072  }
  0x3a   : > { %1962 = vsyncadd (%p2080_p6), %s357_s14, 4294966224  ;;  %p426_p1 = scmp.eq.s32.totalorder %s1981_s27, 0  ;;  %s369_s20 = scalar_lea.vmem [#allocation10], %s2179_s4 }
  0x3b   : > { %s378_s22 = scalar_lea.vmem [#allocation11], %s2179_s4  ;;  %s387_s24 = scalar_lea.vmem [#allocation12], %s2179_s4  ;;  %v432_v0 = vld [vmem:[#allocation7] sm:$0xff] (%p426_p1)   ;;  %v434_v1 = vld [vmem:[#allocation7 + $0x8] sm:$0xff] (%p426_p1)   ;;  %v436_v2 = vld [vmem:[#allocation7 + $0x10] sm:$0xff] (%p426_p1)  }
  0x3c   : > { %431 = sbr.rel (!%p426_p1) target bundleno = 68 (0x44), region = 76  ;;  %448 = vst [vmem:[#allocation2] sm:$0xff] (%p426_p1), %v432_v0   ;;  %v438_v3 = vld [vmem:[#allocation7 + $0x18] sm:$0xff] (%p426_p1)   ;;  %v440_v4 = vld [vmem:[#allocation7 + $0x20] sm:$0xff] (%p426_p1)   ;;  %v442_v5 = vld [vmem:[#allocation7 + $0x28] sm:$0xff] (%p426_p1)  }
  0x3d   : > { %450 = vst [vmem:[#allocation2 + $0x8] sm:$0xff] (%p426_p1), %v434_v1   ;;  %v444_v6 = vld [vmem:[#allocation7 + $0x30] sm:$0xff] (%p426_p1)   ;;  %v446_v7 = vld [vmem:[#allocation7 + $0x38] sm:$0xff] (%p426_p1)  }
  0x3e   : > { %452 = vst [vmem:[#allocation2 + $0x10] sm:$0xff] (%p426_p1), %v436_v2  }
  0x3f   : > { %454 = vst [vmem:[#allocation2 + $0x18] sm:$0xff] (%p426_p1), %v438_v3  }
  0x40   : > { %456 = vst [vmem:[#allocation2 + $0x20] sm:$0xff] (%p426_p1), %v440_v4  }
  0x41   : > { %458 = vst [vmem:[#allocation2 + $0x28] sm:$0xff] %v442_v5  }
  0x42   : > { %460 = vst [vmem:[#allocation2 + $0x30] sm:$0xff] %v444_v6  }
  0x43   : > { %462 = vst [vmem:[#allocation2 + $0x38] sm:$0xff] %v446_v7  }
  0x44 PF: > { %v1526_v16 = vld [vmem:[#allocation4] sm:$0xff]  ;;  %v1527_v18 = vld [vmem:[#allocation4 + $0x8] sm:$0xff]  ;;  %v1541_v20 = vld [vmem:[%s2182_s17 + $0x38] sm:$0xff]  ;;  %p1149_p2 = scmp.eq.s32.totalorder %s1981_s27, 2 }
  0x45   : > { %v1530_v17 = vld [vmem:[#allocation4 + $0x20] sm:$0xff]  ;;  %v1531_v19 = vld [vmem:[#allocation4 + $0x28] sm:$0xff]  ;;  %812 = vmatpush.bf16.msra.mxu1 %v1541_v20  ;;  %v1540_v21 = vld [vmem:[%s2182_s17 + $0x30] sm:$0xff]  ;;  %1606 = vmatpush.bf16.msra.mxu3 %v1541_v20 }
  0x46   : > { %v1518_v15 = vld [vmem:[#allocation2] sm:$0xff]  ;;  %v1539_v22 = vld [vmem:[%s2182_s17 + $0x28] sm:$0xff]  ;;  %v1528_v24 = vld [vmem:[#allocation4 + $0x10] sm:$0xff] }
  0x47   : > { %v1519_v14 = vld [vmem:[#allocation2 + $0x8] sm:$0xff]  ;;  %v1538_v23 = vld [vmem:[%s2182_s17 + $0x20] sm:$0xff]  ;;  %v1532_v25 = vld [vmem:[#allocation4 + $0x30] sm:$0xff] }
  0x48   : > { %v1520_v13 = vld [vmem:[#allocation2 + $0x10] sm:$0xff]  ;;  %v1537_v26 = vld [vmem:[%s2182_s17 + $0x18] sm:$0xff]  ;;  %v1535_v30 = vld [vmem:[%s2182_s17 + $0x8] sm:$0xff] }
  0x49   : > { %v1524_v9 = vld [vmem:[#allocation2 + $0x30] sm:$0xff]  ;;  %v1521_v12 = vld [vmem:[#allocation2 + $0x18] sm:$0xff]  ;;  %813 = vmatpush.bf16.msra.mxu1 %v1540_v21  ;;  %1607 = vmatpush.bf16.msra.mxu3 %v1540_v21  ;;  %v1534_v31 = vld [vmem:[%s2182_s17] sm:$0xff] }
  0x4a   : > { %v1525_v8 = vld [vmem:[#allocation2 + $0x38] sm:$0xff]  ;;  %v1522_v11 = vld [vmem:[#allocation2 + $0x20] sm:$0xff]  ;;  %v1536_v29 = vld [vmem:[%s2182_s17 + $0x10] sm:$0xff] }
  0x4b   : > { %597 = vmatpush.bf16.msra.mxu0 %v1525_v8  ;;  %1598 = vmatpush.bf16.msra.mxu2 %v1525_v8  ;;  %v1523_v10 = vld [vmem:[#allocation2 + $0x28] sm:$0xff]  ;;  %v1529_v27 = vld [vmem:[#allocation4 + $0x18] sm:$0xff]  ;;  %v1714_v2 = vld [vmem:[%s369_s20] ss:$0 sm:$0xff] }
  0x4c   : > { %v1533_v28 = vld [vmem:[#allocation4 + $0x38] sm:$0xff] }
  0x4d   : > { %814 = vmatpush.bf16.msra.mxu1 %v1539_v22  ;;  %1608 = vmatpush.bf16.msra.mxu3 %v1539_v22 }
  0x4f   : > { %598 = vmatpush.bf16.msra.mxu0 %v1524_v9  ;;  %1599 = vmatpush.bf16.msra.mxu2 %v1524_v9 }
  0x51   : > { %815 = vmatpush.bf16.msra.mxu1 %v1538_v23  ;;  %1609 = vmatpush.bf16.msra.mxu3 %v1538_v23 }
  0x53   : > { %599 = vmatpush.bf16.msra.mxu0 %v1523_v10  ;;  %1600 = vmatpush.bf16.msra.mxu2 %v1523_v10 }
  0x55   : > { %816 = vmatpush.bf16.msra.mxu1 %v1537_v26  ;;  %1610 = vmatpush.bf16.msra.mxu3 %v1537_v26 }
  0x57   : > { %600 = vmatpush.bf16.msra.mxu0 %v1522_v11  ;;  %1601 = vmatpush.bf16.msra.mxu2 %v1522_v11 }
  0x59   : > { %817 = vmatpush.bf16.msra.mxu1 %v1536_v29  ;;  %1611 = vmatpush.bf16.msra.mxu3 %v1536_v29 }
  0x5b   : > { %601 = vmatpush.bf16.msra.mxu0 %v1521_v12  ;;  %1602 = vmatpush.bf16.msra.mxu2 %v1521_v12 }
  0x5d   : > { %818 = vmatpush.bf16.msra.mxu1 %v1535_v30  ;;  %1612 = vmatpush.bf16.msra.mxu3 %v1535_v30 }
  0x5f   : > { %602 = vmatpush.bf16.msra.mxu0 %v1520_v13  ;;  %1603 = vmatpush.bf16.msra.mxu2 %v1520_v13 }
  0x61   : > { %819 = vmatpush.bf16.msra.mxu1 %v1534_v31  ;;  %1613 = vmatpush.bf16.msra.mxu3 %v1534_v31 }
  0x63   : > { %603 = vmatpush.bf16.msra.mxu0 %v1519_v14  ;;  %1604 = vmatpush.bf16.msra.mxu2 %v1519_v14 }
  0x67   : > { %604 = vmatpush.bf16.msra.mxu0 %v1518_v15  ;;  %1605 = vmatpush.bf16.msra.mxu2 %v1518_v15 }
  0x6a   : > { %605 = vmatmul.bf16.vlgmr.msra.gmra.mxu0 %v1526_v16  ;;  %625 = vmatmul.bf16.vlgmr.msra.gmra.mxu2 %v1530_v17 }
  0x7a   : > { %610 = vmatmul.bf16.gmra.mxu0 %v1527_v18  ;;  %630 = vmatmul.bf16.gmra.mxu2 %v1531_v19 }
  0x8a   : > { %615 = vmatmul.bf16.gmra.mxu0 %v1528_v24  ;;  %635 = vmatmul.bf16.gmra.mxu2 %v1532_v25 }
  0x9a   : > { %620 = vmatmul.bf16.gmra.mxu0 %v1529_v27  ;;  %640 = vmatmul.bf16.gmra.mxu2 %v1533_v28 }
  0xe7   : > { %v606_v32 = vpop.f32.mrf.mxu0 }
  0xed   : > { %v626_v33 = vpop.f32.mrf.mxu2 }
  0xef   : > { %v608_v34 = vpop.f32.mrf.mxu0 }
  0xf0   : > { %v736_v35 = vpack.c.bf16 %v608_v34, %v606_v32 }
  0xf2   : > { %820 = vmatmul.bf16.vlgmr.msra.gmra.mxu1 %v736_v35 }
  0xf5   : > { %v628_v36 = vpop.f32.mrf.mxu2 }
  0xf6   : > { %v740_v37 = vpack.c.bf16 %v628_v36, %v626_v33 }
  0xf7   : > { %v611_v38 = vpop.f32.mrf.mxu0 }
  0xf8   : > { %840 = vmatmul.bf16.vlgmr.msra.gmra.mxu3 %v740_v37 }
  0xfd   : > { %v631_v39 = vpop.f32.mrf.mxu2 }
  0xff   : > { %v613_v40 = vpop.f32.mrf.mxu0 }
 0x100   : > { %v737_v41 = vpack.c.bf16 %v613_v40, %v611_v38 }
 0x102   : > { %825 = vmatmul.bf16.gmra.mxu1 %v737_v41 }
 0x105   : > { %v633_v42 = vpop.f32.mrf.mxu2 }
 0x106   : > { %v741_v43 = vpack.c.bf16 %v633_v42, %v631_v39 }
 0x107   : > { %v616_v44 = vpop.f32.mrf.mxu0 }
 0x108   : > { %845 = vmatmul.bf16.gmra.mxu3 %v741_v43 }
 0x10d   : > { %v636_v45 = vpop.f32.mrf.mxu2 }
 0x10f   : > { %v618_v46 = vpop.f32.mrf.mxu0 }
 0x110   : > { %v738_v47 = vpack.c.bf16 %v618_v46, %v616_v44 }
 0x112   : > { %830 = vmatmul.bf16.gmra.mxu1 %v738_v47 }
 0x115   : > { %v638_v48 = vpop.f32.mrf.mxu2 }
 0x116   : > { %v742_v49 = vpack.c.bf16 %v638_v48, %v636_v45 }
 0x117   : > { %v621_v50 = vpop.f32.mrf.mxu0 }
 0x118   : > { %850 = vmatmul.bf16.gmra.mxu3 %v742_v49 }
 0x11d   : > { %v641_v51 = vpop.f32.mrf.mxu2 }
 0x11f   : > { %v623_v52 = vpop.f32.mrf.mxu0 }
 0x120   : > { %v739_v53 = vpack.c.bf16 %v623_v52, %v621_v50 }
 0x122   : > { %835 = vmatmul.bf16.gmra.mxu1 %v739_v53 }
 0x125   : > { %v643_v54 = vpop.f32.mrf.mxu2 }
 0x126   : > { %v743_v55 = vpack.c.bf16 %v643_v54, %v641_v51 }
 0x128   : > { %855 = vmatmul.bf16.gmra.mxu3 %v743_v55 }
 0x16f   : > { %v821_v56 = vpop.f32.mrf.mxu1 }
 0x170   : > { %v822_v7 = vadd.f32 %v1714_v2, %v821_v56 }
 0x177   : > { %v823_v57 = vpop.f32.mrf.mxu1 }
 0x178   : > { %v824_v5 = vadd.f32 %v1714_v2, %v823_v57 }
 0x17a   : > { %v942_v11 = vadd.f32 %v824_v5, %v822_v7 }
 0x17b   : > { %v841_v58 = vpop.f32.mrf.mxu3 }
 0x17c   : > { %v842_v23 = vadd.f32 %v1714_v2, %v841_v58 }
 0x17e   : > { %v934_v30 = vmul.f32 0.0, %v842_v23 }
 0x17f   : > { %v826_v59 = vpop.f32.mrf.mxu1 }
 0x180   : > { %v827_v3 = vadd.f32 %v1714_v2, %v826_v59 }
 0x182   : > { %v928_v8 = vmul.f32 0.0, %v827_v3 }
 0x183   : > { %v843_v60 = vpop.f32.mrf.mxu3 }
 0x184   : > { %v943_v14 = vadd.f32 %v942_v11, %v928_v8  ;;  %v844_v26 = vadd.f32 %v1714_v2, %v843_v60 }
 0x186   : > { %v935_v33 = vmul.f32 0.0, %v844_v26 }
 0x187   : > { %v828_v61 = vpop.f32.mrf.mxu1 }
 0x188   : > { %v829_v6 = vadd.f32 %v1714_v2, %v828_v61 }
 0x18a   : > { %v929_v12 = vmul.f32 0.0, %v829_v6 }
 0x18b   : > { %v846_v62 = vpop.f32.mrf.mxu3 }
 0x18c   : > { %v944_v18 = vadd.f32 %v943_v14, %v929_v12  ;;  %v847_v31 = vadd.f32 %v1714_v2, %v846_v62 }
 0x18e   : > { %v936_v36 = vmul.f32 0.0, %v847_v31 }
 0x18f   : > { %v831_v63 = vpop.f32.mrf.mxu1 }
 0x190   : > { %v832_v9 = vadd.f32 %v1714_v2, %v831_v63 }
 0x192   : > { %v930_v15 = vmul.f32 0.0, %v832_v9 }
 0x193   : > { %v848_v0 = vpop.f32.mrf.mxu3 }
 0x194   : > { %v945_v20 = vadd.f32 %v944_v18, %v930_v15  ;;  %v849_v34 = vadd.f32 %v1714_v2, %v848_v0 }
 0x196   : > { %v937_v39 = vmul.f32 0.0, %v849_v34 }
 0x197   : > { %v833_v1 = vpop.f32.mrf.mxu1 }
 0x198   : > { %v834_v13 = vadd.f32 %v1714_v2, %v833_v1 }
 0x19a   : > { %v931_v19 = vmul.f32 0.0, %v834_v13 }
 0x19b   : > { %v851_v4 = vpop.f32.mrf.mxu3 }
 0x19c   : > { %v946_v24 = vadd.f32 %v945_v20, %v931_v19  ;;  %v852_v37 = vadd.f32 %v1714_v2, %v851_v4 }
 0x19e   : > { %v938_v43 = vmul.f32 0.0, %v852_v37 }
 0x19f   : > { %v836_v10 = vpop.f32.mrf.mxu1 }
 0x1a0   : > { %v837_v16 = vadd.f32 %v1714_v2, %v836_v10 }
 0x1a2   : > { %v932_v21 = vmul.f32 0.0, %v837_v16 }
 0x1a3   : > { %v853_v17 = vpop.f32.mrf.mxu3 }
 0x1a4   : > { %v947_v27 = vadd.f32 %v946_v24, %v932_v21  ;;  %v854_v40 = vadd.f32 %v1714_v2, %v853_v17 }
 0x1a6   : > { %v939_v46 = vmul.f32 0.0, %v854_v40 }
 0x1a7   : > { %v838_v22 = vpop.f32.mrf.mxu1 }
 0x1a8   : > { %v839_v25 = vadd.f32 %v1714_v2, %v838_v22 }
 0x1aa   : > { %v933_v28 = vmul.f32 0.0, %v839_v25 }
 0x1ab   : > { %v856_v29 = vpop.f32.mrf.mxu3 }
 0x1ac   : > { %v948_v32 = vadd.f32 %v947_v27, %v933_v28  ;;  %v857_v44 = vadd.f32 %v1714_v2, %v856_v29 }
 0x1ae   : > { %v949_v35 = vadd.f32 %v948_v32, %v934_v30  ;;  %v940_v49 = vmul.f32 0.0, %v857_v44 }
 0x1b0   : > { %v950_v38 = vadd.f32 %v949_v35, %v935_v33 }
 0x1b2   : > { %v951_v41 = vadd.f32 %v950_v38, %v936_v36 }
 0x1b3   : > { %v858_v42 = vpop.f32.mrf.mxu3 }
 0x1b4   : > { %v952_v45 = vadd.f32 %v951_v41, %v937_v39  ;;  %v859_v48 = vadd.f32 %v1714_v2, %v858_v42 }
 0x1b6   : > { %v953_v47 = vadd.f32 %v952_v45, %v938_v43  ;;  %v941_v52 = vmul.f32 0.0, %v859_v48 }
 0x1b8   : > { %v954_v50 = vadd.f32 %v953_v47, %v939_v46 }
 0x1ba   : > { %v955_v51 = vadd.f32 %v954_v50, %v940_v49 }
 0x1bc   : > { %v956_v53 = vadd.f32 %v955_v51, %v941_v52 }
 0x1be   : > { %v957_v54 = vrot.slane %v956_v53, 4 }
 0x1c0   : > { %v958_v55 = vadd.f32 %v957_v54, %v956_v53 }
 0x1c2   : > { %v959_v56 = vrot.slane %v958_v55, 2 }
 0x1c4   : > { %v960_v57 = vadd.f32 %v959_v56, %v958_v55 }
 0x1c6   : > { %v961_v58 = vrot.slane %v960_v57, 1 }
 0x1c8   : > { %v962_v59 = vadd.f32 %v961_v58, %v960_v57 }
 0x1ca   : > { %v963_v60 = vmul.f32 0.0625, %v962_v59 }
 0x1cc   : > { %v2203_v61 = vsub.f32 %v827_v3, %v963_v60  ;;  %v2205_v62 = vsub.f32 %v822_v7, %v963_v60  ;;  %v2207_v63 = vsub.f32 %v824_v5, %v963_v60  ;;  %v2209_v0 = vsub.f32 %v829_v6, %v963_v60 }
 0x1cd   : > { %v2212_v2 = vsub.f32 %v832_v9, %v963_v60  ;;  %v2218_v10 = vsub.f32 %v834_v13, %v963_v60  ;;  %v2221_v11 = vsub.f32 %v837_v16, %v963_v60  ;;  %v2224_v12 = vsub.f32 %v839_v25, %v963_v60 }
 0x1ce   : > { %v982_v1 = vmul.f32 0.0, %v2203_v61  ;;  %v996_v4 = vmul.f32 %v2205_v62, %v2205_v62  ;;  %v997_v8 = vmul.f32 %v2207_v63, %v2207_v63  ;;  %v983_v3 = vmul.f32 0.0, %v2209_v0 }
 0x1cf   : > { %v984_v5 = vmul.f32 0.0, %v2212_v2  ;;  %v985_v9 = vmul.f32 0.0, %v2218_v10  ;;  %v2227_v17 = vsub.f32 %v842_v23, %v963_v60  ;;  %v986_v18 = vmul.f32 0.0, %v2221_v11 }
 0x1d0   : > { %v998_v7 = vmul.f32 %v982_v1, %v982_v1  ;;  %v1012_v6 = vadd.f32 %v997_v8, %v996_v4  ;;  %v999_v14 = vmul.f32 %v983_v3, %v983_v3  ;;  %v2230_v20 = vsub.f32 %v844_v26, %v963_v60 }
 0x1d1   : > { %v1000_v13 = vmul.f32 %v984_v5, %v984_v5  ;;  %v987_v16 = vmul.f32 0.0, %v2224_v12  ;;  %v1001_v21 = vmul.f32 %v985_v9, %v985_v9  ;;  %v2233_v24 = vsub.f32 %v847_v31, %v963_v60 }
 0x1d2   : > { %v1013_v15 = vadd.f32 %v1012_v6, %v998_v7  ;;  %v988_v25 = vmul.f32 0.0, %v2227_v17  ;;  %v1002_v27 = vmul.f32 %v986_v18, %v986_v18  ;;  %v975_v29 = vsub.f32 %v849_v34, %v963_v60 }
 0x1d3   : > { %v989_v23 = vmul.f32 0.0, %v2230_v20  ;;  %v1003_v30 = vmul.f32 %v987_v16, %v987_v16  ;;  %v976_v33 = vsub.f32 %v852_v37, %v963_v60  ;;  %v990_v35 = vmul.f32 0.0, %v2233_v24 }
 0x1d4   : > { %v1014_v19 = vadd.f32 %v1013_v15, %v999_v14  ;;  %v1004_v26 = vmul.f32 %v988_v25, %v988_v25  ;;  %v977_v38 = vsub.f32 %v854_v40, %v963_v60  ;;  %v991_v39 = vmul.f32 0.0, %v975_v29  ;;  %v1715_v25 = vld [vmem:[%s378_s22] ss:$0 sm:$0xff] }
 0x1d5   : > { %v1005_v41 = vmul.f32 %v989_v23, %v989_v23  ;;  %v978_v31 = vsub.f32 %v857_v44, %v963_v60  ;;  %v992_v43 = vmul.f32 0.0, %v976_v33  ;;  %v1006_v45 = vmul.f32 %v990_v35, %v990_v35 }
 0x1d6   : > { %v1015_v22 = vadd.f32 %v1014_v19, %v1000_v13  ;;  %v979_v47 = vsub.f32 %v859_v48, %v963_v60  ;;  %v993_v49 = vmul.f32 0.0, %v977_v38  ;;  %v1007_v34 = vmul.f32 %v991_v39, %v991_v39 }
 0x1d7   : > { %v994_v51 = vmul.f32 0.0, %v978_v31  ;;  %v1008_v52 = vmul.f32 %v992_v43, %v992_v43 }
 0x1d8   : > { %v1016_v28 = vadd.f32 %v1015_v22, %v1001_v21  ;;  %v995_v37 = vmul.f32 0.0, %v979_v47  ;;  %v1009_v54 = vmul.f32 %v993_v49, %v993_v49 }
 0x1d9   : > { %v1010_v56 = vmul.f32 %v994_v51, %v994_v51 }
 0x1da   : > { %v1017_v32 = vadd.f32 %v1016_v28, %v1002_v27  ;;  %v1011_v40 = vmul.f32 %v995_v37, %v995_v37 }
 0x1dc   : > { %v1018_v36 = vadd.f32 %v1017_v32, %v1003_v30 }
 0x1de   : > { %v1019_v42 = vadd.f32 %v1018_v36, %v1004_v26 }
 0x1e0   : > { %v1020_v46 = vadd.f32 %v1019_v42, %v1005_v41 }
 0x1e2   : > { %v1021_v50 = vadd.f32 %v1020_v46, %v1006_v45 }
 0x1e4   : > { %v1022_v53 = vadd.f32 %v1021_v50, %v1007_v34 }
 0x1e6   : > { %v1023_v55 = vadd.f32 %v1022_v53, %v1008_v52 }
 0x1e8   : > { %v1024_v57 = vadd.f32 %v1023_v55, %v1009_v54 }
 0x1ea   : > { %v1025_v58 = vadd.f32 %v1024_v57, %v1010_v56 }
 0x1ec   : > { %v1026_v59 = vadd.f32 %v1025_v58, %v1011_v40 }
 0x1ee   : > { %v1027_v1 = vrot.slane %v1026_v59, 4 }
 0x1f0   : > { %v1028_v44 = vadd.f32 %v1027_v1, %v1026_v59 }
 0x1f2   : > { %v1029_v4 = vrot.slane %v1028_v44, 2 }
 0x1f4   : > { %v1030_v8 = vadd.f32 %v1029_v4, %v1028_v44 }
 0x1f6   : > { %v1031_v3 = vrot.slane %v1030_v8, 1 }
 0x1f8   : > { %v1032_v48 = vadd.f32 %v1031_v3, %v1030_v8 }
 0x1fa   : > { %v1033_v60 = vmul.f32 0.0625, %v1032_v48 }
 0x1fc   : > { %v1034_v7 = vadd.f32 1e-05, %v1033_v60 }
 0x1fe   : > { %1717 = vrsqrt.f32 %v1034_v7  ;;  %vm1041_vm1 = vweird.f32 %v1034_v7 }
 0x204   : > { %v1718_v5 = vpop.eup %1717 }
 0x205   : > { %v1036_v6 = vmul.f32 %v1718_v5, %v1034_v7  ;;  %vm1042_vm0 = vweird.f32 %v1718_v5 }
 0x206   : > { %vm1043_vm2 = vmor %vm1041_vm1, %vm1042_vm0 }
 0x207   : > { %v1037_v9 = vmul.f32 %v1718_v5, %v1036_v6 }
 0x209   : > { %v1038_v14 = vmul.f32 0.5, %v1037_v9 }
 0x20b   : > { %v1039_v15 = vsub.f32 1.5, %v1038_v14 }
 0x20d   : > { %v1040_v18 = vmul.f32 %v1718_v5, %v1039_v15 }
 0x20f   : > { %v1044_v13 = vsel %vm1043_vm2, %v1718_v5, %v1040_v18 }
 0x210   : > { %v1045_v19 = vmul.f32 %v1044_v13, %v2205_v62  ;;  %v1046_v16 = vmul.f32 %v1044_v13, %v2207_v63  ;;  %v1047_v21 = vmul.f32 %v1044_v13, %v2203_v61  ;;  %v1048_v22 = vmul.f32 %v1044_v13, %v2209_v0 }
 0x211   : > { %v1049_v27 = vmul.f32 %v1044_v13, %v2212_v2  ;;  %v1050_v28 = vmul.f32 %v1044_v13, %v2218_v10  ;;  %v1051_v23 = vmul.f32 %v1044_v13, %v2221_v11  ;;  %v1052_v30 = vmul.f32 %v1044_v13, %v2224_v12  ;;  %v1716_v10 = vld [vmem:[%s387_s24] ss:$0 sm:$0xff] }
 0x212   : > { %v1053_v32 = vmul.f32 %v1044_v13, %v2227_v17  ;;  %v1054_v62 = vmul.f32 %v1044_v13, %v2230_v20  ;;  %v1055_v63 = vmul.f32 %v1044_v13, %v2233_v24  ;;  %v1056_v61 = vmul.f32 %v1044_v13, %v975_v29 }
 0x213   : > { %v1057_v35 = vmul.f32 %v1044_v13, %v976_v33  ;;  %v1058_v0 = vmul.f32 %v1044_v13, %v977_v38  ;;  %v1059_v26 = vmul.f32 %v1044_v13, %v978_v31  ;;  %v1060_v36 = vmul.f32 %v1044_v13, %v979_v47 }
 0x214   : > { %v1065_v39 = vmul.f32 %v1715_v25, %v1045_v19  ;;  %v1066_v2 = vmul.f32 %v1715_v25, %v1046_v16  ;;  %v1067_v41 = vmul.f32 %v1715_v25, %v1047_v21  ;;  %v1068_v42 = vmul.f32 %v1715_v25, %v1048_v22 }
 0x215   : > { %v1069_v11 = vmul.f32 %v1715_v25, %v1049_v27  ;;  %v1070_v43 = vmul.f32 %v1715_v25, %v1050_v28  ;;  %v1071_v12 = vmul.f32 %v1715_v25, %v1051_v23  ;;  %v1072_v45 = vmul.f32 %v1715_v25, %v1052_v30 }
 0x216   : > { %v1073_v17 = vmul.f32 %v1715_v25, %v1053_v32  ;;  %v1074_v46 = vmul.f32 %v1715_v25, %v1054_v62  ;;  %v1075_v20 = vmul.f32 %v1715_v25, %v1055_v63  ;;  %v1076_v49 = vmul.f32 %v1715_v25, %v1056_v61 }
 0x217   : > { %v1077_v24 = vmul.f32 %v1715_v25, %v1057_v35  ;;  %v1078_v29 = vmul.f32 %v1715_v25, %v1058_v0  ;;  %v1079_v33 = vmul.f32 %v1715_v25, %v1059_v26  ;;  %v1080_v38 = vmul.f32 %v1715_v25, %v1060_v36 }
 0x218   : > { %v1085_v31 = vadd.f32 %v1716_v10, %v1065_v39  ;;  %v1086_v47 = vadd.f32 %v1716_v10, %v1066_v2  ;;  %v1087_v34 = vadd.f32 %v1716_v10, %v1067_v41  ;;  %v1088_v50 = vadd.f32 %v1716_v10, %v1068_v42  ;;  %v1154_v2 = vld [vmem:[%s2286_s6] sm:$0xf] (%p1149_p2) }
 0x219   : > { %v1089_v51 = vadd.f32 %v1716_v10, %v1069_v11  ;;  %v1090_v52 = vadd.f32 %v1716_v10, %v1070_v43  ;;  %v1091_v53 = vadd.f32 %v1716_v10, %v1071_v12  ;;  %v1092_v37 = vadd.f32 %v1716_v10, %v1072_v45 }
 0x21a   : > { %v1093_v54 = vadd.f32 %v1716_v10, %v1073_v17  ;;  %v1094_v55 = vadd.f32 %v1716_v10, %v1074_v46  ;;  %v1095_v56 = vadd.f32 %v1716_v10, %v1075_v20  ;;  %v1096_v57 = vadd.f32 %v1716_v10, %v1076_v49 }
 0x21b   : > { %v1097_v40 = vadd.f32 %v1716_v10, %v1077_v24  ;;  %v1098_v58 = vadd.f32 %v1716_v10, %v1078_v29  ;;  %v1099_v59 = vadd.f32 %v1716_v10, %v1079_v33  ;;  %v1100_v1 = vadd.f32 %v1716_v10, %v1080_v38 }
 0x21c   : > { %v1101_v44 = vmax.f32 %v1085_v31, 0.0  ;;  %v1102_v4 = vmax.f32 %v1086_v47, 0.0  ;;  %v1103_v8 = vmax.f32 %v1087_v34, 0.0  ;;  %v1104_v3 = vmax.f32 %v1088_v50, 0.0 }
 0x21d   : > { %v1105_v48 = vmax.f32 %v1089_v51, 0.0  ;;  %v1106_v60 = vmax.f32 %v1090_v52, 0.0  ;;  %v1107_v7 = vmax.f32 %v1091_v53, 0.0  ;;  %v1108_v5 = vmax.f32 %v1092_v37, 0.0 }
 0x21e   : > { %v1109_v6 = vmax.f32 %v1093_v54, 0.0  ;;  %v1110_v9 = vmax.f32 %v1094_v55, 0.0  ;;  %v1111_v14 = vmax.f32 %v1095_v56, 0.0  ;;  %v1112_v15 = vmax.f32 %v1096_v57, 0.0 }
 0x21f   : > { %v1113_v18 = vmax.f32 %v1097_v40, 0.0  ;;  %v1114_v13 = vmax.f32 %v1098_v58, 0.0  ;;  %v1554_v19 = vpack.c.bf16 %v1102_v4, %v1101_v44  ;;  %v1559_v16 = vpack.c.bf16 %v1104_v3, %v1103_v8 }
 0x220   : > { %v1564_v21 = vpack.c.bf16 %v1106_v60, %v1105_v48  ;;  %v1115_v22 = vmax.f32 %v1099_v59, 0.0  ;;  %v1116_v25 = vmax.f32 %v1100_v1, 0.0  ;;  %v1569_v27 = vpack.c.bf16 %v1108_v5, %v1107_v7 }
 0x221   : > { %1555 = vst [vmem:[#allocation2] sm:$0xff] %v1554_v19   ;;  %v1574_v28 = vpack.c.bf16 %v1110_v9, %v1109_v6  ;;  %v1579_v23 = vpack.c.bf16 %v1112_v15, %v1111_v14  ;;  %v1584_v30 = vpack.c.bf16 %v1114_v13, %v1113_v18 }
 0x222   : > { %1591 = vst [vmem:[#allocation2 + $0x8] sm:$0xff] %v1559_v16   ;;  %v1589_v32 = vpack.c.bf16 %v1116_v25, %v1115_v22 }
 0x223   : > { %1592 = vst [vmem:[#allocation2 + $0x10] sm:$0xff] %v1564_v21  }
 0x224   : > { %1593 = vst [vmem:[#allocation2 + $0x18] sm:$0xff] %v1569_v27   ;;  %1153 = sbr.rel (!%p1149_p2) target bundleno = 725 (0x2d5), region = 92 }
 0x225   : > { %1594 = vst [vmem:[#allocation2 + $0x20] sm:$0xff] %v1574_v28  }
 0x226   : > { %1595 = vst [vmem:[#allocation2 + $0x28] sm:$0xff] %v1579_v23  }
 0x227   : > { %1596 = vst [vmem:[#allocation2 + $0x30] sm:$0xff] %v1584_v30  }
 0x228   : > { %1597 = vst [vmem:[#allocation2 + $0x38] sm:$0xff] %v1589_v32   ;;  %v1543_v39 = vld [vmem:[#allocation2] sm:$0xff] (%p1149_p2) }
 0x229   : > { %v1544_v36 = vld [vmem:[#allocation2 + $0x8] sm:$0xff] }
 0x22a   : > { %v1545_v26 = vld [vmem:[#allocation2 + $0x10] sm:$0xff] }
 0x22b   : > { %v1546_v0 = vld [vmem:[#allocation2 + $0x18] sm:$0xff] }
 0x22c   : > { %v1547_v35 = vld [vmem:[#allocation2 + $0x20] sm:$0xff] }
 0x22d   : > { %v1548_v61 = vld [vmem:[#allocation2 + $0x28] sm:$0xff] }
 0x22e   : > { %v1549_v63 = vld [vmem:[#allocation2 + $0x30] sm:$0xff] }
 0x22f   : > { %v1550_v62 = vld [vmem:[#allocation2 + $0x38] sm:$0xff] }
 0x230   : > { %1219 = vmatpush.bf16.msra.mxu0 %v1550_v62 }
 0x234   : > { %1220 = vmatpush.bf16.msra.mxu0 %v1549_v63 }
 0x238   : > { %1221 = vmatpush.bf16.msra.mxu0 %v1548_v61 }
 0x23c   : > { %1222 = vmatpush.bf16.msra.mxu0 %v1547_v35 }
 0x240   : > { %1223 = vmatpush.bf16.msra.mxu0 %v1546_v0 }
 0x244   : > { %1224 = vmatpush.bf16.msra.mxu0 %v1545_v26 }
 0x248   : > { %1225 = vmatpush.bf16.msra.mxu0 %v1544_v36 }
 0x24c   : > { %1226 = vmatpush.bf16.msra.mxu0 %v1543_v39 }
 0x24f   : > { %1227 = vmatmul.bf16.vlgmr.msra.gmra.mxu0 %v1154_v2 }
 0x2cc   : > { %v1228_v41 = vpop.f32.mrf.mxu0 }
 0x2cd   : > { %1232 = vst [vmem:[#allocation13] sm:$0xff] %v1228_v41 }
 0x2d4   : > { %v1230_v42 = vpop.f32.mrf.mxu0 }
 0x2d5 PF: > { %p1659_p3 = scmp.eq.s32.totalorder %s2065_s30, 2  ;;  %s2310_s21 = sld [smem:[#allocation23_spill]] }
 0x2d6   : > { %s1995_s16 = smov [#allocation13]  }
 0x2d7   : > { %s1239_s9 = sshll.u32 %s1995_s16, 4  ;;  %s1240_s9 = int_to_ptr.vmem [resolvable:$true] %s1239_s9 }
 0x2db   : > { %s1241_s19 = sshll.u32 %s2310_s21, 4  ;;  %s1242_s19 = int_to_ptr.hbm [resolvable:$true] %s1241_s19 }
 0x2dc   : > { %1631 = dma.vmem_to_hbm [thread:$0]  (%p1659_p3), %s1240_s9, 128, %s1242_s19, [#allocation6]  }
 0x2dd   : > { %1964 = dma.done.wait (%p1659_p3), [#allocation6], 128  }
 0x2de   : > { %1966 = vsyncadd (%p1659_p3), [#allocation6], 4294967168 }
 0x2df PF: > { %s20_s29 = sadd.s32 1, %s1989_s29   ;;  %s2311_s30 = sld [smem:[#allocation18_spill]] }
 0x2e0   : > { %p17_p4 = scmp.ge.s32.totalorder %s20_s29, 5   ;;  %s2312_s24 = smov %s1973_s25 }
 0x2e1   : > { %s2313_s25 = smov %s1977_s26  ;;  %s2314_s26 = smov %s2123_s0 }
 0x2e2   : > { %s2315_s27 = smov %s1985_s28  ;;  %19 = sbr.rel (!%p17_p4) target bundleno = 11 (0xb), region = 146 }
 0x2e5   : > { %s2316_s28 = smov %s2311_s30 }
 0x2e7   :  { %1255 = vsyncpa [#allocation5], 1 }
 0x2e8   :  { %1257 = vsyncpa [#allocation5 + $0x1], 1 }
 0x2e9   :  { %1258 = vsyncpa [#allocation8], 1 }
 0x2ea   :  { %1259 = vsyncpa [#allocation6], 1 }
 0x2eb   :  { %1261 = vsyncpa [#allocation6 + $0x1], 1 }

</bundles_post_ra>
